<compile_context>
chip_gen: v7x
topology: tpu7x:2x2x1
jax: 0.10.0
libtpu: 0.0.40
codegen_flags: <defaults>
</compile_context>

<pallas_src>
import functools

import jax
import jax.numpy as jnp
from jax.experimental import pallas as pl
from jax.experimental.pallas import tpu as pltpu

LANE = 128


def _round_up(n, m):
    return (n + m - 1) // m * m


def _pad2(a, rows, cols):
    return jnp.pad(a, ((0, rows - a.shape[0]), (0, cols - a.shape[1])))


def _pick_tile_b(B):
    """Batch tile: big tiles to amortize per-grid-step overhead, >=2 tiles for
    non-tiny batches so both v7x TensorCores get work."""
    if B <= 16:
        return _round_up(B, 8)
    if B <= 4096:
        return _round_up(pl.cdiv(B, 2), 16)
    return 2048


def _vae_kernel(x_ref, eps_ref, we1_ref, wms_ref, wd1_ref, wdo_ref, b_ref,
                out_ref, zml_ref, *, HP, ZP, XP):
    x = x_ref[...]                                # (TILE_B, XP) bf16
    eps = eps_ref[...].astype(jnp.float32)        # (TILE_B, ZP) f32 for elementwise math

    # Packed biases (static, 128-aligned slices: zero-cost views).
    be1 = b_ref[:, 0:HP]
    bms = b_ref[:, HP:HP + 2 * ZP]
    bd1 = b_ref[:, HP + 2 * ZP:2 * HP + 2 * ZP]
    bdo = b_ref[:, 2 * HP + 2 * ZP:2 * HP + 2 * ZP + XP]

    # ---- encoder: h = relu(x @ We1 + be1) ----
    h = jnp.dot(x, we1_ref[...], preferred_element_type=jnp.float32) + be1
    h = jnp.maximum(h, 0.0)

    # ---- fused mu | log_var head (single MXU matmul) ----
    ms = jnp.dot(h.astype(jnp.bfloat16), wms_ref[...],
                 preferred_element_type=jnp.float32) + bms
    mu = ms[:, :ZP]
    log_var = ms[:, ZP:]

    # ---- reparameterization: z = eps * exp(0.5 * log_var) + mu ----
    std = jnp.exp(0.5 * log_var)
    z = eps * std + mu

    # ---- decoder: relu(relu(z @ Wd1 + bd1) @ Wdout + bdo) ----
    hd = jnp.dot(z.astype(jnp.bfloat16), wd1_ref[...],
                 preferred_element_type=jnp.float32) + bd1
    hd = jnp.maximum(hd, 0.0)
    out = jnp.dot(hd.astype(jnp.bfloat16), wdo_ref[...],
                  preferred_element_type=jnp.float32) + bdo
    out = jnp.maximum(out, 0.0)

    # Lane-dense stores; zml via three 128-aligned slice stores (no concat temp).
    out_ref[...] = out.astype(out_ref.dtype)
    zml_ref[:, 0:ZP] = z
    zml_ref[:, ZP:2 * ZP] = mu
    zml_ref[:, 2 * ZP:3 * ZP] = log_var


def prepare_vae_params(params):
    """One-time weight/bias prep (pad to 128 lanes, fuse mu|sigma head, pack
    biases, cast matmul operands to bf16). Hoisted out of the per-call path."""
    x_dim, h_dim1 = params["we1"].shape
    z_dim = params["wmu"].shape[1]
    XP = _round_up(x_dim, LANE)
    HP = _round_up(h_dim1, LANE)
    ZP = _round_up(z_dim, LANE)

    we1 = _pad2(params["we1"], XP, HP).astype(jnp.bfloat16)
    wms = jnp.concatenate([_pad2(params["wmu"], HP, ZP),
                           _pad2(params["wsg"], HP, ZP)], axis=1).astype(jnp.bfloat16)
    wd1 = _pad2(params["wd1"], ZP, HP).astype(jnp.bfloat16)
    wdo = _pad2(params["wdo"], HP, XP).astype(jnp.bfloat16)
    b_all = jnp.concatenate([
        _pad2(params["be1"], 1, HP),
        _pad2(params["bmu"], 1, ZP),
        _pad2(params["bsg"], 1, ZP),
        _pad2(params["bd1"], 1, HP),
        _pad2(params["bdo"], 1, XP),
    ], axis=1).astype(jnp.float32)

    return dict(we1=we1, wms=wms, wd1=wd1, wdo=wdo, b_all=b_all,
                dims=(x_dim, h_dim1, z_dim, XP, HP, ZP))


def vae_forward(x, eps, prepped):
    """Runs VAENetwork.forward with prepared params; eps is the Gaussian noise."""
    x_dim, h_dim1, z_dim, XP, HP, ZP = prepped["dims"]
    B = x.shape[0]

    TILE_B = _pick_tile_b(B)
    BP = _round_up(B, TILE_B)
    n_tiles = BP // TILE_B

    # Streaming inputs in bf16 (halves the dominant HBM read stream).
    xp = _pad2(x, BP, XP).astype(jnp.bfloat16)
    ep = _pad2(eps, BP, ZP).astype(jnp.bfloat16)

    we1, wms, wd1, wdo, b_all = (prepped["we1"], prepped["wms"], prepped["wd1"],
                                 prepped["wdo"], prepped["b_all"])
    BW = b_all.shape[1]

    kernel = functools.partial(_vae_kernel, HP=HP, ZP=ZP, XP=XP)

    # --- VMEM budget (double-buffered streams + resident weights + scratch) ---
    tile_io = TILE_B * (XP * 2 + ZP * 2 + XP * 2 + 3 * ZP * 4)          # x, eps, out, zml
    resident = 2 * ((XP * HP + HP * 2 * ZP + ZP * HP + HP * XP) * 2 + BW * 4)
    scratch = TILE_B * (2 * HP + 4 * ZP + XP) * 4                        # f32 intermediates
    est = 2 * tile_io + resident + scratch
    try:
        vmem_cap = pltpu.get_tpu_info().vmem_capacity_bytes
    except Exception:
        vmem_cap = 64 * 1024 * 1024        # conservative: v7x per-TC VMEM
    vmem_limit = int(min(0.75 * vmem_cap, max(16 * 1024 * 1024, 1.5 * est)))

    flops = 2 * BP * (XP * HP + HP * 2 * ZP + ZP * HP + HP * XP)
    bytes_accessed = (
        xp.size * 2 + ep.size * 2 + b_all.size * 4
        + (we1.size + wms.size + wd1.size + wdo.size) * 2
        + BP * XP * 2 + BP * 3 * ZP * 4
    )
    cost = pl.CostEstimate(flops=flops, transcendentals=BP * ZP,
                           bytes_accessed=bytes_accessed)

    resident_map = lambda i: (0, 0)   # weights/biases stay VMEM-resident across tiles

    out_p, zml_p = pl.pallas_call(
        kernel,
        grid=(n_tiles,),
        in_specs=[
            pl.BlockSpec((TILE_B, XP), lambda i: (i, 0)),   # x (bf16)
            pl.BlockSpec((TILE_B, ZP), lambda i: (i, 0)),   # eps (bf16)
            pl.BlockSpec((XP, HP), resident_map),           # We1
            pl.BlockSpec((HP, 2 * ZP), resident_map),       # Wmu|Wsigma fused
            pl.BlockSpec((ZP, HP), resident_map),           # Wd1
            pl.BlockSpec((HP, XP), resident_map),           # Wdout
            pl.BlockSpec((1, BW), resident_map),            # packed biases
        ],
        out_specs=(
            pl.BlockSpec((TILE_B, XP), lambda i: (i, 0)),       # out (bf16)
            pl.BlockSpec((TILE_B, 3 * ZP), lambda i: (i, 0)),   # z|mu|log_var (f32)
        ),
        out_shape=(
            jax.ShapeDtypeStruct((BP, XP), jnp.bfloat16),
            jax.ShapeDtypeStruct((BP, 3 * ZP), jnp.float32),
        ),
        compiler_params=pltpu.CompilerParams(
            dimension_semantics=("parallel",),
            vmem_limit_bytes=vmem_limit,
        ),
        cost_estimate=cost,
    )(xp, ep, we1, wms, wd1, wdo, b_all)

    out = out_p[:B, :x_dim].astype(jnp.float32)
    z = zml_p[:B, 0:z_dim]
    mu = zml_p[:B, ZP:ZP + z_dim]
    log_var = zml_p[:B, 2 * ZP:2 * ZP + z_dim]
    return out, z, mu, log_var


def init_params(key, x_dim, h_dim1, z_dim):
    """Deterministic synthetic parameters (Linear weights stored as (in, out))."""
    ks = jax.random.split(key, 10)

    def lin(kw, kb, fan_in, fan_out):
        bound = 1.0 / jnp.sqrt(fan_in)
        w = jax.random.uniform(kw, (fan_in, fan_out), jnp.float32, -bound, bound)
        b = jax.random.uniform(kb, (1, fan_out), jnp.float32, -bound, bound)
        return w, b

    we1, be1 = lin(ks[0], ks[1], x_dim, h_dim1)    # fce1
    wmu, bmu = lin(ks[2], ks[3], h_dim1, z_dim)    # fcMu
    wsg, bsg = lin(ks[4], ks[5], h_dim1, z_dim)    # fcSigma
    wd1, bd1 = lin(ks[6], ks[7], z_dim, h_dim1)    # fcd1
    wdo, bdo = lin(ks[8], ks[9], h_dim1, x_dim)    # fcdout
    return dict(we1=we1, be1=be1, wmu=wmu, bmu=bmu, wsg=wsg, bsg=bsg,
                wd1=wd1, bd1=bd1, wdo=wdo, bdo=bdo)


def vae_forward_ref(x, eps, p, matmul_dtype=jnp.float32):
    """Pure-JAX reference of VAENetwork.forward (eps supplied explicitly)."""
    def mm(a, w):
        return jnp.dot(a.astype(matmul_dtype), w.astype(matmul_dtype),
                       preferred_element_type=jnp.float32)

    h = jax.nn.relu(mm(x, p["we1"]) + p["be1"])
    mu = mm(h, p["wmu"]) + p["bmu"]
    log_var = mm(h, p["wsg"]) + p["bsg"]
    z = eps * jnp.exp(0.5 * log_var) + mu
    hd = jax.nn.relu(mm(z, p["wd1"]) + p["bd1"])
    out = jax.nn.relu(mm(hd, p["wdo"]) + p["bdo"])
    return out, z, mu, log_var


if __name__ == "__main__":
    # Small shapes consistent with the module's Linear stack.
    B, X_DIM, H_DIM1, Z_DIM = 8, 32, 64, 16

    key = jax.random.PRNGKey(0)
    k_param, k_x, k_eps = jax.random.split(key, 3)

    params = init_params(k_param, X_DIM, H_DIM1, Z_DIM)
    # Inputs are pre-rounded to bf16-representable values so the kernel's bf16
    # input DMA is lossless relative to the references.
    x = jax.random.normal(k_x, (B, X_DIM), jnp.float32)
    x = x.astype(jnp.bfloat16).astype(jnp.float32)
    # TODO(synk): torch.randn_like(std) sampling is done host-side (jax.random)
    # and passed in as eps so the forward pass is deterministic.
    eps = jax.random.normal(k_eps, (B, Z_DIM), jnp.float32)
    eps = eps.astype(jnp.bfloat16).astype(jnp.float32)

    prepped = prepare_vae_params(params)          # one-time weight prep (hoisted)
    out, z, mu, log_var = jax.block_until_ready(vae_forward(x, eps, prepped))

    # Reference mirroring the kernel's bf16 matmul operands (f32 accumulate).
    r_out, r_z, r_mu, r_lv = vae_forward_ref(x, eps, params, matmul_dtype=jnp.bfloat16)
    assert jnp.allclose(out, r_out, atol=1e-2, rtol=1e-2)   # out stored as bf16
    assert jnp.allclose(z, r_z, atol=2e-3, rtol=2e-3)
    assert jnp.allclose(mu, r_mu, atol=2e-3, rtol=2e-3)
    assert jnp.allclose(log_var, r_lv, atol=2e-3, rtol=2e-3)

    # Sanity check against the full-f32 reference (loose: bf16 rounding).
    f_out, _, f_mu, f_lv = vae_forward_ref(x, eps, params, matmul_dtype=jnp.float32)
    assert jnp.allclose(out, f_out, atol=5e-2, rtol=5e-2)
    assert jnp.allclose(mu, f_mu, atol=5e-2, rtol=5e-2)
    assert jnp.allclose(log_var, f_lv, atol=5e-2, rtol=5e-2)

    print("KERNEL_OK")
</pallas_src>

<mosaic_0001>
module attributes {stable_mosaic.version = 11 : i64} {
  func.func @_vae_kernel(%arg0: i32, %arg1: memref<8x128xbf16, #tpu.memory_space<vmem>>, %arg2: memref<8x128xbf16, #tpu.memory_space<vmem>>, %arg3: memref<128x128xbf16, #tpu.memory_space<vmem>>, %arg4: memref<128x256xbf16, #tpu.memory_space<vmem>>, %arg5: memref<128x128xbf16, #tpu.memory_space<vmem>>, %arg6: memref<128x128xbf16, #tpu.memory_space<vmem>>, %arg7: memref<1x640xf32, #tpu.memory_space<vmem>>, %arg8: memref<8x128xbf16, #tpu.memory_space<vmem>>, %arg9: memref<8x384xf32, #tpu.memory_space<vmem>>) attributes {dimension_semantics = [#tpu.dimension_semantics<parallel>], iteration_bounds = array<i64: 1>, scalar_prefetch = 0 : i64, scratch_operands = 0 : i64, tpu.core_type = #tpu.core_type<tc>, window_params = [{transform_indices = @transform_0, window_bounds = array<i64: 8, 128>}, {transform_indices = @transform_1, window_bounds = array<i64: 8, 128>}, {pipeline_mode = #tpu.pipeline_mode<synchronous>, transform_indices = @transform_2, window_bounds = array<i64: 128, 128>}, {pipeline_mode = #tpu.pipeline_mode<synchronous>, transform_indices = @transform_3, window_bounds = array<i64: 128, 256>}, {pipeline_mode = #tpu.pipeline_mode<synchronous>, transform_indices = @transform_4, window_bounds = array<i64: 128, 128>}, {pipeline_mode = #tpu.pipeline_mode<synchronous>, transform_indices = @transform_5, window_bounds = array<i64: 128, 128>}, {pipeline_mode = #tpu.pipeline_mode<synchronous>, transform_indices = @transform_6, window_bounds = array<i64: 1, 640>}, {transform_indices = @transform_7, window_bounds = array<i64: 8, 128>}, {transform_indices = @transform_8, window_bounds = array<i64: 8, 384>}]} {
    %c0 = arith.constant 0 : index
    %c0_0 = arith.constant 0 : index
    %0 = vector.load %arg1[%c0, %c0_0] : memref<8x128xbf16, #tpu.memory_space<vmem>>, vector<8x128xbf16>
    %c0_1 = arith.constant 0 : index
    %c0_2 = arith.constant 0 : index
    %1 = vector.load %arg2[%c0_1, %c0_2] : memref<8x128xbf16, #tpu.memory_space<vmem>>, vector<8x128xbf16>
    %2 = arith.extf %1 : vector<8x128xbf16> to vector<8x128xf32>
    %c0_3 = arith.constant 0 : index
    %c0_4 = arith.constant 0 : index
    %3 = vector.load %arg7[%c0_3, %c0_4] : memref<1x640xf32, #tpu.memory_space<vmem>>, vector<1x128xf32>
    %c0_5 = arith.constant 0 : index
    %c128 = arith.constant 128 : index
    %4 = vector.load %arg7[%c0_5, %c128] : memref<1x640xf32, #tpu.memory_space<vmem>>, vector<1x256xf32>
    %c0_6 = arith.constant 0 : index
    %c384 = arith.constant 384 : index
    %5 = vector.load %arg7[%c0_6, %c384] : memref<1x640xf32, #tpu.memory_space<vmem>>, vector<1x128xf32>
    %c0_7 = arith.constant 0 : index
    %c512 = arith.constant 512 : index
    %6 = vector.load %arg7[%c0_7, %c512] : memref<1x640xf32, #tpu.memory_space<vmem>>, vector<1x128xf32>
    %c0_8 = arith.constant 0 : index
    %c0_9 = arith.constant 0 : index
    %7 = vector.load %arg3[%c0_8, %c0_9] : memref<128x128xbf16, #tpu.memory_space<vmem>>, vector<128x128xbf16>
    %cst = arith.constant dense<0.000000e+00> : vector<8x128xf32>
    %8 = tpu.matmul %0, %7, %cst {dimension_numbers = #tpu.dot_dimension_numbers<[1], [0], [0], [1], [0, 0, 1, 1], [], []>} : vector<8x128xbf16>, vector<128x128xbf16>, vector<8x128xf32> -> vector<8x128xf32>
    %9 = vector.broadcast %3 : vector<1x128xf32> to vector<8x128xf32>
    %10 = arith.addf %8, %9 : vector<8x128xf32>
    %cst_10 = arith.constant 0.000000e+00 : f32
    %11 = vector.broadcast %cst_10 : f32 to vector<8x128xf32>
    %12 = arith.maximumf %10, %11 : vector<8x128xf32>
    %13 = arith.truncf %12 : vector<8x128xf32> to vector<8x128xbf16>
    %c0_11 = arith.constant 0 : index
    %c0_12 = arith.constant 0 : index
    %14 = vector.load %arg4[%c0_11, %c0_12] : memref<128x256xbf16, #tpu.memory_space<vmem>>, vector<128x256xbf16>
    %cst_13 = arith.constant dense<0.000000e+00> : vector<8x256xf32>
    %15 = tpu.matmul %13, %14, %cst_13 {dimension_numbers = #tpu.dot_dimension_numbers<[1], [0], [0], [1], [0, 0, 1, 1], [], []>} : vector<8x128xbf16>, vector<128x256xbf16>, vector<8x256xf32> -> vector<8x256xf32>
    %16 = vector.broadcast %4 : vector<1x256xf32> to vector<8x256xf32>
    %17 = arith.addf %15, %16 : vector<8x256xf32>
    %18 = vector.extract_strided_slice %17 {offsets = [0, 0], sizes = [8, 128], strides = [1, 1]} : vector<8x256xf32> to vector<8x128xf32>
    %19 = vector.extract_strided_slice %17 {offsets = [0, 128], sizes = [8, 128], strides = [1, 1]} : vector<8x256xf32> to vector<8x128xf32>
    %cst_14 = arith.constant 5.000000e-01 : f32
    %20 = vector.broadcast %cst_14 : f32 to vector<8x128xf32>
    %21 = arith.mulf %20, %19 : vector<8x128xf32>
    %22 = math.exp %21 : vector<8x128xf32>
    %23 = arith.mulf %2, %22 : vector<8x128xf32>
    %24 = arith.addf %23, %18 : vector<8x128xf32>
    %25 = arith.truncf %24 : vector<8x128xf32> to vector<8x128xbf16>
    %c0_15 = arith.constant 0 : index
    %c0_16 = arith.constant 0 : index
    %26 = vector.load %arg5[%c0_15, %c0_16] : memref<128x128xbf16, #tpu.memory_space<vmem>>, vector<128x128xbf16>
    %cst_17 = arith.constant dense<0.000000e+00> : vector<8x128xf32>
    %27 = tpu.matmul %25, %26, %cst_17 {dimension_numbers = #tpu.dot_dimension_numbers<[1], [0], [0], [1], [0, 0, 1, 1], [], []>} : vector<8x128xbf16>, vector<128x128xbf16>, vector<8x128xf32> -> vector<8x128xf32>
    %28 = vector.broadcast %5 : vector<1x128xf32> to vector<8x128xf32>
    %29 = arith.addf %27, %28 : vector<8x128xf32>
    %cst_18 = arith.constant 0.000000e+00 : f32
    %30 = vector.broadcast %cst_18 : f32 to vector<8x128xf32>
    %31 = arith.maximumf %29, %30 : vector<8x128xf32>
    %32 = arith.truncf %31 : vector<8x128xf32> to vector<8x128xbf16>
    %c0_19 = arith.constant 0 : index
    %c0_20 = arith.constant 0 : index
    %33 = vector.load %arg6[%c0_19, %c0_20] : memref<128x128xbf16, #tpu.memory_space<vmem>>, vector<128x128xbf16>
    %cst_21 = arith.constant dense<0.000000e+00> : vector<8x128xf32>
    %34 = tpu.matmul %32, %33, %cst_21 {dimension_numbers = #tpu.dot_dimension_numbers<[1], [0], [0], [1], [0, 0, 1, 1], [], []>} : vector<8x128xbf16>, vector<128x128xbf16>, vector<8x128xf32> -> vector<8x128xf32>
    %35 = vector.broadcast %6 : vector<1x128xf32> to vector<8x128xf32>
    %36 = arith.addf %34, %35 : vector<8x128xf32>
    %cst_22 = arith.constant 0.000000e+00 : f32
    %37 = vector.broadcast %cst_22 : f32 to vector<8x128xf32>
    %38 = arith.maximumf %36, %37 : vector<8x128xf32>
    %39 = arith.truncf %38 : vector<8x128xf32> to vector<8x128xbf16>
    %c0_23 = arith.constant 0 : index
    %c0_24 = arith.constant 0 : index
    %40 = vector.load %arg8[%c0_23, %c0_24] : memref<8x128xbf16, #tpu.memory_space<vmem>>, vector<8x128xbf16>
    tpu.vector_store %arg8[%c0_23, %c0_24], %39 {strides = array<i32>} : memref<8x128xbf16, #tpu.memory_space<vmem>>, vector<8x128xbf16>,
    %c0_25 = arith.constant 0 : index
    %c0_26 = arith.constant 0 : index
    %41 = vector.load %arg9[%c0_25, %c0_26] : memref<8x384xf32, #tpu.memory_space<vmem>>, vector<8x128xf32>
    tpu.vector_store %arg9[%c0_25, %c0_26], %24 {strides = array<i32>} : memref<8x384xf32, #tpu.memory_space<vmem>>, vector<8x128xf32>,
    %c0_27 = arith.constant 0 : index
    %c128_28 = arith.constant 128 : index
    %42 = vector.load %arg9[%c0_27, %c128_28] : memref<8x384xf32, #tpu.memory_space<vmem>>, vector<8x128xf32>
    tpu.vector_store %arg9[%c0_27, %c128_28], %18 {strides = array<i32>} : memref<8x384xf32, #tpu.memory_space<vmem>>, vector<8x128xf32>,
    %c0_29 = arith.constant 0 : index
    %c256 = arith.constant 256 : index
    %43 = vector.load %arg9[%c0_29, %c256] : memref<8x384xf32, #tpu.memory_space<vmem>>, vector<8x128xf32>
    tpu.vector_store %arg9[%c0_29, %c256], %19 {strides = array<i32>} : memref<8x384xf32, #tpu.memory_space<vmem>>, vector<8x128xf32>,
    return
  }
  func.func @transform_0(%arg0: i32) -> (i32, i32) {
    %c0_i32 = arith.constant 0 : i32
    %c0_i32_0 = arith.constant 0 : i32
    return %arg0, %c0_i32 : i32, i32
  }
  func.func @transform_1(%arg0: i32) -> (i32, i32) {
    %c0_i32 = arith.constant 0 : i32
    %c0_i32_0 = arith.constant 0 : i32
    return %arg0, %c0_i32 : i32, i32
  }
  func.func @transform_2(%arg0: i32) -> (i32, i32) {
    %c0_i32 = arith.constant 0 : i32
    %c0_i32_0 = arith.constant 0 : i32
    %c0_i32_1 = arith.constant 0 : i32
    return %c0_i32, %c0_i32_0 : i32, i32
  }
  func.func @transform_3(%arg0: i32) -> (i32, i32) {
    %c0_i32 = arith.constant 0 : i32
    %c0_i32_0 = arith.constant 0 : i32
    %c0_i32_1 = arith.constant 0 : i32
    return %c0_i32, %c0_i32_0 : i32, i32
  }
  func.func @transform_4(%arg0: i32) -> (i32, i32) {
    %c0_i32 = arith.constant 0 : i32
    %c0_i32_0 = arith.constant 0 : i32
    %c0_i32_1 = arith.constant 0 : i32
    return %c0_i32, %c0_i32_0 : i32, i32
  }
  func.func @transform_5(%arg0: i32) -> (i32, i32) {
    %c0_i32 = arith.constant 0 : i32
    %c0_i32_0 = arith.constant 0 : i32
    %c0_i32_1 = arith.constant 0 : i32
    return %c0_i32, %c0_i32_0 : i32, i32
  }
  func.func @transform_6(%arg0: i32) -> (i32, i32) {
    %c0_i32 = arith.constant 0 : i32
    %c0_i32_0 = arith.constant 0 : i32
    %c0_i32_1 = arith.constant 0 : i32
    return %c0_i32, %c0_i32_0 : i32, i32
  }
  func.func @transform_7(%arg0: i32) -> (i32, i32) {
    %c0_i32 = arith.constant 0 : i32
    %c0_i32_0 = arith.constant 0 : i32
    return %arg0, %c0_i32 : i32, i32
  }
  func.func @transform_8(%arg0: i32) -> (i32, i32) {
    %c0_i32 = arith.constant 0 : i32
    %c0_i32_0 = arith.constant 0 : i32
    return %arg0, %c0_i32 : i32, i32
  }
}

</mosaic_0001>

<bundles_post_ra>
// kernel: tpu_custom_call.1
= control target key start
LH: loop header
LB: loop body
LE: loop exit
PB: predicated region body
PF: predicated region fallthrough
CT: control target
= control target key end

     0   :  { %14 = vsyncpa [#allocation3], 0  ;;  %s1253_s0 = inlined_call_operand.hbm [shape: bf16[8,128], index: 0, kind: input, shape index: {}]   ;;  %s1254_s1 = inlined_call_operand.hbm [shape: bf16[8,128], index: 1, kind: input, shape index: {}]   ;;  %s1255_s2 = inlined_call_operand.hbm [shape: bf16[128,128], index: 2, kind: input, shape index: {}]   ;;  %s1256_s3 = inlined_call_operand.hbm [shape: bf16[128,256], index: 3, kind: input, shape index: {}]   ;;  %s1257_s4 = inlined_call_operand.hbm [shape: bf16[128,128], index: 4, kind: input, shape index: {}]   ;;  %s1258_s5 = inlined_call_operand.hbm [shape: bf16[128,128], index: 5, kind: input, shape index: {}]   ;;  %s1259_s6 = inlined_call_operand.vmem [shape: f32[1,640], index: 6, kind: input, shape index: {}]   ;;  %s1260_s7 = inlined_call_operand.hbm [shape: bf16[8,128], index: 7, kind: output, shape index: {0}]   ;;  %s1261_s8 = inlined_call_operand.hbm [shape: f32[8,384], index: 8, kind: output, shape index: {1}]  }
   0x1   :  { %15 = vsyncpa [#allocation6], 0 }
   0x2   :  { %16 = vsyncpa [#allocation9], 0 }
   0x3   :  { %17 = vsyncpa [#allocation12], 0 }
   0x4   :  { %18 = vsyncpa [#allocation4], 0 }
   0x5   :  { %19 = vsyncpa [#allocation15], 0  ;;  %s1025_s27 = smov [#allocation5]   ;;  %s1026_s29 = smov [#allocation8]  }
   0x6   :  { %s36_s28 = sshll.u32 %s1025_s27, 4  ;;  %s57_s30 = sshll.u32 %s1026_s29, 4  ;;  %s37_s28 = int_to_ptr.vmem [resolvable:$true] %s36_s28  ;;  %s1085_s30 = int_to_ptr.vmem [resolvable:$true] %s57_s30 }
   0x7   :  { %s837_s11 = scalar_lea.hbm %s1254_s1, 64 }
   0x8   :  { %p838_p0 = scmp.ne.s32.totalorder %s1254_s1, %s837_s11  ;;  %p841_p1 = scmp.lt.u32.totalorder %s837_s11, %s1254_s1 }
   0xa   :  { %p843_p2 = pnand %p841_p1, %p838_p0 }
   0xc   :  { %846 = shalt.err (!%p843_p2)
}
   0xd   :  { %s847_s16 = scalar_lea.vmem %s37_s28, 64  ;;  %p852_p4 = scmp.lt.s32.totalorder %s37_s28, %s37_s28 }
   0xe   :  { %p848_p3 = scmp.ne.s32.totalorder %s37_s28, %s847_s16  ;;  %p853_p5 = scmp.lt.s32.totalorder %s847_s16, %s847_s16 }
  0x10   :  { %p854_p6 = por %p853_p5, %p852_p4 }
  0x12   :  { %p855_p7 = pnand %p854_p6, %p848_p3 }
  0x14   :  { %858 = shalt.err (!%p855_p7)
}
  0x15   :  { %39 = dma.hbm_to_vmem [thread:$0]  %s1254_s1, 64, %s37_s28, [#allocation6]  }
  0x16   :  { %s859_s21 = scalar_lea.hbm %s1256_s3, 2048 }
  0x17   :  { %p860_p8 = scmp.ne.s32.totalorder %s1256_s3, %s859_s21  ;;  %p863_p9 = scmp.lt.u32.totalorder %s859_s21, %s1256_s3 }
  0x19   :  { %p865_p10 = pnand %p863_p9, %p860_p8 }
  0x1b   :  { %868 = shalt.err (!%p865_p10)
}
  0x1c   :  { %s869_s26 = scalar_lea.vmem %s1085_s30, 2048  ;;  %p874_p12 = scmp.lt.s32.totalorder %s1085_s30, %s1085_s30 }
  0x1d   :  { %p870_p11 = scmp.ne.s32.totalorder %s1085_s30, %s869_s26  ;;  %p875_p13 = scmp.lt.s32.totalorder %s869_s26, %s869_s26 }
  0x1f   :  { %p876_p0 = por %p875_p13, %p874_p12 }
  0x21   :  { %p877_p1 = pnand %p876_p0, %p870_p11 }
  0x23   :  { %880 = shalt.err (!%p877_p1)
}
  0x24   :  { %s1027_s1 = smov 128   ;;  %s1028_s27 = smov 8  }
  0x25   :  { %63 = dma.hbm_to_vmem [thread:$0]  %s1256_s3, 2048, %s1085_s30, [#allocation9], %s1027_s1, %s1027_s1, %s1028_s27  }
  0x26   :  { %s1029_s9 = smov [#allocation2]   ;;  %s1030_s11 = smov [#allocation7]  }
  0x27   :  { %s26_s10 = sshll.u32 %s1029_s9, 4  ;;  %s45_s12 = sshll.u32 %s1030_s11, 4  ;;  %s27_s10 = int_to_ptr.vmem [resolvable:$true] %s26_s10  ;;  %s1116_s12 = int_to_ptr.vmem [resolvable:$true] %s45_s12 }
  0x28   :  { %s881_s15 = scalar_lea.hbm %s1253_s0, 64 }
  0x29   :  { %p882_p2 = scmp.ne.s32.totalorder %s1253_s0, %s881_s15  ;;  %p885_p3 = scmp.lt.u32.totalorder %s881_s15, %s1253_s0 }
  0x2b   :  { %p887_p4 = pnand %p885_p3, %p882_p2 }
  0x2d   :  { %890 = shalt.err (!%p887_p4)
}
  0x2e   :  { %s891_s3 = scalar_lea.vmem %s27_s10, 64  ;;  %p896_p6 = scmp.lt.s32.totalorder %s27_s10, %s27_s10 }
  0x2f   :  { %p892_p5 = scmp.ne.s32.totalorder %s27_s10, %s891_s3  ;;  %p897_p7 = scmp.lt.s32.totalorder %s891_s3, %s891_s3 }
  0x31   :  { %p898_p8 = por %p897_p7, %p896_p6 }
  0x33   :  { %p899_p9 = pnand %p898_p8, %p892_p5 }
  0x35   :  { %902 = shalt.err (!%p899_p9)
}
  0x36   :  { %29 = dma.hbm_to_vmem [thread:$0]  %s1253_s0, 64, %s27_s10, [#allocation3]  }
  0x37   :  { %s903_s23 = scalar_lea.hbm %s1255_s2, 1024 }
  0x38   :  { %p904_p10 = scmp.ne.s32.totalorder %s1255_s2, %s903_s23  ;;  %p907_p11 = scmp.lt.u32.totalorder %s903_s23, %s1255_s2 }
  0x3a   :  { %p909_p12 = pnand %p907_p11, %p904_p10 }
  0x3c   :  { %912 = shalt.err (!%p909_p12)
}
  0x3d   :  { %s913_s27 = scalar_lea.vmem %s1116_s12, 1024  ;;  %p918_p0 = scmp.lt.s32.totalorder %s1116_s12, %s1116_s12 }
  0x3e   :  { %p914_p13 = scmp.ne.s32.totalorder %s1116_s12, %s913_s27  ;;  %p919_p1 = scmp.lt.s32.totalorder %s913_s27, %s913_s27 }
  0x40   :  { %p920_p2 = por %p919_p1, %p918_p0 }
  0x42   :  { %p921_p3 = pnand %p920_p2, %p914_p13 }
  0x44   :  { %924 = shalt.err (!%p921_p3)
}
  0x45   :  { %s1031_s0 = smov 64   ;;  %s1032_s28 = smov 4  }
  0x46   :  { %51 = dma.hbm_to_vmem [thread:$0]  %s1255_s2, 1024, %s1116_s12, [#allocation6], %s1031_s0, %s1031_s0, %s1032_s28  }
  0x47   :  { %s1033_s10 = smov [#allocation10]   ;;  %s1034_s13 = smov [#allocation11]  }
  0x48   :  { %s69_s11 = sshll.u32 %s1033_s10, 4  ;;  %s81_s14 = sshll.u32 %s1034_s13, 4  ;;  %s70_s11 = int_to_ptr.vmem [resolvable:$true] %s69_s11  ;;  %s1150_s14 = int_to_ptr.vmem [resolvable:$true] %s81_s14 }
  0x49   :  { %s925_s17 = scalar_lea.hbm %s1257_s4, 1024 }
  0x4a   :  { %p926_p4 = scmp.ne.s32.totalorder %s1257_s4, %s925_s17  ;;  %p929_p5 = scmp.lt.u32.totalorder %s925_s17, %s1257_s4 }
  0x4c   :  { %p931_p6 = pnand %p929_p5, %p926_p4 }
  0x4e   :  { %934 = shalt.err (!%p931_p6)
}
  0x4f   :  { %s935_s2 = scalar_lea.vmem %s70_s11, 1024  ;;  %p940_p8 = scmp.lt.s32.totalorder %s70_s11, %s70_s11 }
  0x50   :  { %p936_p7 = scmp.ne.s32.totalorder %s70_s11, %s935_s2  ;;  %p941_p9 = scmp.lt.s32.totalorder %s935_s2, %s935_s2 }
  0x52   :  { %p942_p10 = por %p941_p9, %p940_p8 }
  0x54   :  { %p943_p11 = pnand %p942_p10, %p936_p7 }
  0x56   :  { %946 = shalt.err (!%p943_p11)
}
  0x57   :  { %75 = dma.hbm_to_vmem [thread:$0]  %s1257_s4, 1024, %s70_s11, [#allocation9], %s1031_s0, %s1031_s0, %s1032_s28  }
  0x58   :  { %s947_s23 = scalar_lea.hbm %s1258_s5, 1024 }
  0x59   :  { %p948_p12 = scmp.ne.s32.totalorder %s1258_s5, %s947_s23  ;;  %p951_p13 = scmp.lt.u32.totalorder %s947_s23, %s1258_s5 }
  0x5b   :  { %p953_p0 = pnand %p951_p13, %p948_p12 }
  0x5d   :  { %956 = shalt.err (!%p953_p0)
}
  0x5e   :  { %s957_s27 = scalar_lea.vmem %s1150_s14, 1024  ;;  %p962_p2 = scmp.lt.s32.totalorder %s1150_s14, %s1150_s14 }
  0x5f   :  { %p958_p1 = scmp.ne.s32.totalorder %s1150_s14, %s957_s27  ;;  %p963_p3 = scmp.lt.s32.totalorder %s957_s27, %s957_s27 }
  0x61   :  { %p964_p4 = por %p963_p3, %p962_p2 }
  0x63   :  { %p965_p5 = pnand %p964_p4, %p958_p1 }
  0x65   :  { %968 = shalt.err (!%p965_p5)
}
  0x66   :  { %87 = dma.hbm_to_vmem [thread:$0]  %s1258_s5, 1024, %s1150_s14, [#allocation12], %s1031_s0, %s1031_s0, %s1032_s28  }
  0x67   :  { %1013 = dma.done.wait [#allocation3], 64  }
  0x68   :  { %1014 = vsyncadd [#allocation3], 4294967232 }
  0x69   :  { %1015 = dma.done.wait [#allocation6], 1088  }
  0x6a   :  { %1016 = vsyncadd [#allocation6], 4294966208 }
  0x6b   :  { %1017 = dma.done.wait [#allocation9], 3072  }
  0x6c   :  { %1018 = vsyncadd [#allocation9], 4294964224 }
  0x6d   :  { %1019 = dma.done.wait [#allocation12], 1024  }
  0x6e   :  { %1020 = vsyncadd [#allocation12], 4294966272  ;;  %v1035_v0 = vmov 0.0   ;;  %vm1036_vm0 = vmmov 0   ;;  %v787_v1 = vld [vmem:[#allocation7] sm:$0xff]   ;;  %v788_v2 = vld [vmem:[#allocation7 + $0x8] sm:$0xff]   ;;  %v245_v49 = vlaneseq }
  0x6f   :  { %712 = vmatprep.subr.bf16.mxu0 %v1035_v0  ;;  %728 = vmatprep.mubr.msk.bf16.mxu0 %vm1036_vm0, %v1035_v0  ;;  %v789_v3 = vld [vmem:[#allocation7 + $0x10] sm:$0xff]   ;;  %v795_v4 = vld [vmem:[#allocation8 + $0x4] ss:$8 sps:$4 sm:$0xff]   ;;  %v797_v5 = vld [vmem:[#allocation8] ss:$8 sps:$4 sm:$0xff]   ;;  %v1037_v26 = vmov 0  }
  0x70   :  { %713 = vmatpush3.bf16.msra.mxu0 %v787_v1  ;;  %v790_v6 = vld [vmem:[#allocation7 + $0x18] sm:$0xff]   ;;  %335 = vmatprep.subr.bf16.mxu1 %v795_v4  ;;  %v801_v9 = vld [vmem:[#allocation8 + $0x24] ss:$8 sps:$4 sm:$0xff]   ;;  %v803_v11 = vld [vmem:[#allocation8 + $0x20] ss:$8 sps:$4 sm:$0xff]   ;;  %v246_v50 = vshrl.u32 %v245_v49, 7 }
  0x71   :  { %714 = vmatprep.subr.bf16.mxu0 %v1035_v0  ;;  %v798_v7 = vld [vmem:[#allocation8 + $0x14] ss:$8 sps:$4 sm:$0xff]   ;;  %336 = vmatpush1.bf16.msra.mxu1 %v797_v5  ;;  %v800_v8 = vld [vmem:[#allocation8 + $0x10] ss:$8 sps:$4 sm:$0xff]   ;;  %v791_v10 = vld [vmem:[#allocation7 + $0x20] sm:$0xff]   ;;  %s1038_s13 = smov [#allocation14]  }
  0x72   :  { %337 = vmatprep.subr.bf16.mxu1 %v798_v7  ;;  %v792_v12 = vld [vmem:[#allocation7 + $0x28] sm:$0xff]   ;;  %v804_v13 = vld [vmem:[#allocation8 + $0x34] ss:$8 sps:$4 sm:$0xff]   ;;  %v806_v14 = vld [vmem:[#allocation8 + $0x30] ss:$8 sps:$4 sm:$0xff]   ;;  %367 = vmatprep.mubr.bf16.mxu1 %v1037_v26  ;;  %v247_v51 = vsub.s32 0, %v246_v50 }
  0x73   :  { %v807_v15 = vld [vmem:[#allocation8 + $0x44] ss:$8 sps:$4 sm:$0xff]   ;;  %v793_v16 = vld [vmem:[#allocation7 + $0x30] sm:$0xff]   ;;  %v809_v17 = vld [vmem:[#allocation8 + $0x40] ss:$8 sps:$4 sm:$0xff]   ;;  %v251_v53 = vsub.s32 1, %v246_v50 }
  0x74   :  { %715 = vmatpush3.bf16.msra.mxu0 %v788_v2  ;;  %v810_v18 = vld [vmem:[#allocation8 + $0x54] ss:$8 sps:$4 sm:$0xff]   ;;  %v812_v20 = vld [vmem:[#allocation8 + $0x50] ss:$8 sps:$4 sm:$0xff]   ;;  %v813_v21 = vld [vmem:[#allocation8 + $0x64] ss:$8 sps:$4 sm:$0xff]  }
  0x75   :  { %716 = vmatprep.subr.bf16.mxu0 %v1035_v0  ;;  %338 = vmatpush1.bf16.msra.mxu1 %v800_v8  ;;  %v794_v19 = vld [vmem:[#allocation7 + $0x38] sm:$0xff]   ;;  %v815_v23 = vld [vmem:[#allocation8 + $0x60] ss:$8 sps:$4 sm:$0xff]   ;;  %v642_v29 = vld [vmem:[%s1259_s6] ss:$0 sm:$0xff]  ;;  %s626_s14 = sshll.u32 %s1038_s13, 4  ;;  %s627_s14 = int_to_ptr.vmem [resolvable:$true] %s626_s14 }
  0x76   :  { %339 = vmatprep.subr.bf16.mxu1 %v801_v9  ;;  %v109_v22 = vld [vmem:[#allocation2] sm:$0xf]  ;;  %v816_v24 = vld [vmem:[#allocation8 + $0x74] ss:$8 sps:$4 sm:$0xff]   ;;  %v819_v27 = vld [vmem:[#allocation10] sm:$0xff]   ;;  %s969_s15 = scalar_lea.vmem %s627_s14, 384  ;;  %p974_p7 = scmp.lt.s32.totalorder %s627_s14, %s627_s14 }
  0x77   :  { %v818_v25 = vld [vmem:[#allocation8 + $0x70] ss:$8 sps:$4 sm:$0xff]   ;;  %v820_v28 = vld [vmem:[#allocation10 + $0x8] sm:$0xff]   ;;  %v823_v39 = vld [vmem:[#allocation10 + $0x20] sm:$0xff]   ;;  %p970_p6 = scmp.ne.s32.totalorder %s627_s14, %s969_s15  ;;  %p975_p8 = scmp.lt.s32.totalorder %s969_s15, %s969_s15 }
  0x78   :  { %717 = vmatpush3.bf16.msra.mxu0 %v789_v3  ;;  %v821_v37 = vld [vmem:[#allocation10 + $0x10] sm:$0xff]   ;;  %v822_v38 = vld [vmem:[#allocation10 + $0x18] sm:$0xff]   ;;  %v824_v40 = vld [vmem:[#allocation10 + $0x28] sm:$0xff]  }
  0x79   :  { %718 = vmatprep.subr.bf16.mxu0 %v1035_v0  ;;  %340 = vmatpush1.bf16.msra.mxu1 %v803_v11  ;;  %v825_v41 = vld [vmem:[#allocation10 + $0x30] sm:$0xff]   ;;  %v826_v42 = vld [vmem:[#allocation10 + $0x38] sm:$0xff]   ;;  %v827_v43 = vld [vmem:[#allocation11] sm:$0xff]   ;;  %p976_p9 = por %p975_p8, %p974_p7 }
  0x7a   :  { %341 = vmatprep.subr.bf16.mxu1 %v804_v13  ;;  %v828_v44 = vld [vmem:[#allocation11 + $0x8] sm:$0xff]   ;;  %v829_v45 = vld [vmem:[#allocation11 + $0x10] sm:$0xff]   ;;  %v830_v46 = vld [vmem:[#allocation11 + $0x18] sm:$0xff]  }
  0x7b   :  { %v831_v47 = vld [vmem:[#allocation11 + $0x20] sm:$0xff]   ;;  %v832_v48 = vld [vmem:[#allocation11 + $0x28] sm:$0xff]   ;;  %v113_v52 = vld [vmem:[%s1259_s6 + $0x1] sm:$0x3]  ;;  %p977_p10 = pnand %p976_p9, %p970_p6 }
  0x7c   :  { %719 = vmatpush3.bf16.msra.mxu0 %v790_v6  ;;  %v248_v54 = vrot.slane %v113_v52, %v247_v51  ;;  %v252_v55 = vrot.slane %v113_v52, %v251_v53  ;;  %v110_v1 = vld [vmem:[#allocation5] sm:$0xf]  ;;  %v833_v7 = vld [vmem:[#allocation11 + $0x30] sm:$0xff]  }
  0x7d   :  { %720 = vmatprep.subr.bf16.mxu0 %v1035_v0  ;;  %342 = vmatpush1.bf16.msra.mxu1 %v806_v14  ;;  %v111_v2 = vunpack.c.l.bf16 %v110_v1  ;;  %v834_v8 = vld [vmem:[#allocation11 + $0x38] sm:$0xff]   ;;  %v667_v9 = vld [vmem:[%s1259_s6 + $0x3] ss:$0 sm:$0xff] }
  0x7e   :  { %343 = vmatprep.subr.bf16.mxu1 %v807_v15 }
  0x80   :  { %721 = vmatpush3.bf16.msra.mxu0 %v791_v10 }
  0x81   :  { %722 = vmatprep.subr.bf16.mxu0 %v1035_v0  ;;  %344 = vmatpush1.bf16.msra.mxu1 %v809_v17 }
  0x82   :  { %345 = vmatprep.subr.bf16.mxu1 %v810_v18 }
  0x84   :  { %723 = vmatpush3.bf16.msra.mxu0 %v792_v12 }
  0x85   :  { %724 = vmatprep.subr.bf16.mxu0 %v1035_v0  ;;  %346 = vmatpush1.bf16.msra.mxu1 %v812_v20 }
  0x86   :  { %347 = vmatprep.subr.bf16.mxu1 %v813_v21 }
  0x88   :  { %725 = vmatpush3.bf16.msra.mxu0 %v793_v16 }
  0x89   :  { %726 = vmatprep.subr.bf16.mxu0 %v1035_v0  ;;  %348 = vmatpush1.bf16.msra.mxu1 %v815_v23 }
  0x8a   :  { %349 = vmatprep.subr.bf16.mxu1 %v816_v24 }
  0x8c   :  { %727 = vmatpush3.bf16.msra.mxu0 %v794_v19 }
  0x8d   :  { %732 = vmatprep.subr.bf16.mxu0 %v1035_v0  ;;  %350 = vmatpush1.bf16.msra.mxu1 %v818_v25 }
  0x8e   :  { %752 = vmatprep.subr.bf16.mxu1 %v1035_v0 }
  0x8f   :  { %729 = vmatmul.mubr.bf16.vlgmr.msra.gmra.mrb[0].mxu0 %v109_v22 }
  0x90   :  { %748 = vmatprep.mubr.msk.bf16.mxu0 %vm1036_vm0, %v1035_v0  ;;  %733 = vmatpush3.bf16.msra.mxu0 %v819_v27 }
  0x91   :  { %734 = vmatprep.subr.bf16.mxu0 %v1035_v0 }
  0x94   :  { %735 = vmatpush3.bf16.msra.mxu0 %v820_v28 }
  0x95   :  { %736 = vmatprep.subr.bf16.mxu0 %v1035_v0 }
  0x98   :  { %737 = vmatpush3.bf16.msra.mxu0 %v821_v37 }
  0x99   :  { %738 = vmatprep.subr.bf16.mxu0 %v1035_v0 }
  0x9c   :  { %739 = vmatpush3.bf16.msra.mxu0 %v822_v38 }
  0x9d   :  { %740 = vmatprep.subr.bf16.mxu0 %v1035_v0 }
  0xa0   :  { %741 = vmatpush3.bf16.msra.mxu0 %v823_v39 }
  0xa1   :  { %742 = vmatprep.subr.bf16.mxu0 %v1035_v0 }
  0xa4   :  { %743 = vmatpush3.bf16.msra.mxu0 %v824_v40 }
  0xa5   :  { %744 = vmatprep.subr.bf16.mxu0 %v1035_v0 }
  0xa8   :  { %745 = vmatpush3.bf16.msra.mxu0 %v825_v41 }
  0xa9   :  { %746 = vmatprep.subr.bf16.mxu0 %v1035_v0 }
  0xac   :  { %747 = vmatpush3.bf16.msra.mxu0 %v826_v42 }
 0x162   :  { %v220_v30 = vpop.f32.mrb[0].mxu0 }
 0x163   :  { %v221_v31 = vadd.f32 %v642_v29, %v220_v30  ;;  %v730_v32 = vpop.f32.mrb[1].mxu0 }
 0x164   :  { %v223_v33 = vpop.f32.mrb[2].mxu0 }
 0x165   :  { %v226_v34 = vmax.f32 %v221_v31, 0.0  ;;  %v731_v35 = vpop.f32.mrb[3].mxu0 }
 0x167   :  { %v227_v36 = vpack.c.bf16 %v226_v34, %v226_v34 }
 0x169   :  { %368 = vmatmul.mubr.bf16.vlgmr.msra.gmra.mrb[0].mxu1 %v227_v36 }
 0x16a   :  { %768 = vmatprep.mubr.msk.bf16.mxu1 %vm1036_vm0, %v1035_v0  ;;  %753 = vmatpush3.bf16.msra.mxu1 %v827_v43 }
 0x16b   :  { %754 = vmatprep.subr.bf16.mxu1 %v1035_v0 }
 0x16e   :  { %755 = vmatpush3.bf16.msra.mxu1 %v828_v44 }
 0x16f   :  { %756 = vmatprep.subr.bf16.mxu1 %v1035_v0 }
 0x172   :  { %757 = vmatpush3.bf16.msra.mxu1 %v829_v45 }
 0x173   :  { %758 = vmatprep.subr.bf16.mxu1 %v1035_v0 }
 0x176   :  { %759 = vmatpush3.bf16.msra.mxu1 %v830_v46 }
 0x177   :  { %760 = vmatprep.subr.bf16.mxu1 %v1035_v0 }
 0x17a   :  { %761 = vmatpush3.bf16.msra.mxu1 %v831_v47 }
 0x17b   :  { %762 = vmatprep.subr.bf16.mxu1 %v1035_v0 }
 0x17e   :  { %763 = vmatpush3.bf16.msra.mxu1 %v832_v48 }
 0x17f   :  { %764 = vmatprep.subr.bf16.mxu1 %v1035_v0 }
 0x182   :  { %765 = vmatpush3.bf16.msra.mxu1 %v833_v7 }
 0x183   :  { %766 = vmatprep.subr.bf16.mxu1 %v1035_v0 }
 0x186   :  { %767 = vmatpush3.bf16.msra.mxu1 %v834_v8 }
 0x23c   :  { %v369_v56 = vpop.f32.mrb[0].mxu1 }
 0x23d   :  { %v370_v57 = vadd.f32 %v369_v56, %v248_v54  ;;  %v371_v58 = vpop.f32.mrb[1].mxu1 }
 0x23e   :  { %v372_v59 = vadd.f32 %v371_v58, %v252_v55  ;;  %v373_v60 = vpop.f32.mrb[2].mxu1 }
 0x23f   :  { %608 = vst [vmem:[#allocation14 + $0x8] sm:$0xff] %v370_v57  ;;  %v374_v61 = vpop.f32.mrb[3].mxu1 }
 0x240   :  { %v376_v62 = vmul.f32 0.5, %v372_v59  ;;  %609 = vst [vmem:[#allocation14 + $0x10] sm:$0xff] %v372_v59 }
 0x242   :  { %v377_v63 = vmul.f32 1.442695, %v376_v62 }
 0x244   :  { %835 = vpow2.f32 %v377_v63 }
 0x24e   :  { %v836_v3 = vpop.eup %835 }
 0x24f   :  { %v379_v4 = vmul.f32 %v836_v3, %v111_v2 }
 0x251   :  { %v380_v5 = vadd.f32 %v379_v4, %v370_v57 }
 0x253   :  { %v381_v6 = vpack.c.bf16 %v380_v5, %v380_v5  ;;  %607 = vst [vmem:[#allocation14] sm:$0xff] %v380_v5 }
 0x255   :  { %749 = vmatmul.mubr.bf16.vlgmr.msra.gmra.mrb[4].mxu0 %v381_v6 }
 0x328   :  { %v486_v10 = vpop.f32.mrb[4].mxu0 }
 0x329   :  { %v487_v11 = vadd.f32 %v667_v9, %v486_v10  ;;  %v750_v12 = vpop.f32.mrb[5].mxu0 }
 0x32a   :  { %v489_v13 = vpop.f32.mrb[6].mxu0 }
 0x32b   :  { %v492_v14 = vmax.f32 %v487_v11, 0.0  ;;  %v751_v15 = vpop.f32.mrb[7].mxu0 }
 0x32d   :  { %v493_v16 = vpack.c.bf16 %v492_v14, %v492_v14 }
 0x32f   :  { %769 = vmatmul.mubr.bf16.vlgmr.msra.gmra.mrb[4].mxu1 %v493_v16 }
 0x330   :  { %980 = shalt.err (!%p977_p10)
}
 0x331   :  { %s981_s18 = scalar_lea.hbm %s1261_s8, 384 }
 0x332   :  { %p982_p11 = scmp.ne.s32.totalorder %s1261_s8, %s981_s18  ;;  %p985_p12 = scmp.lt.u32.totalorder %s981_s18, %s1261_s8 }
 0x334   :  { %p987_p13 = pnand %p985_p12, %p982_p11 }
 0x336   :  { %990 = shalt.err (!%p987_p13)
}
 0x337   :  { %629 = dma.vmem_to_hbm [thread:$0]  %s627_s14, 384, %s1261_s8, [#allocation15]   ;;  %v676_v0 = vld [vmem:[%s1259_s6 + $0x4] ss:$0 sm:$0xff] }
 0x338   :  { %s1039_s23 = smov [#allocation13]  }
 0x339   :  { %s616_s24 = sshll.u32 %s1039_s23, 4  ;;  %s617_s24 = int_to_ptr.vmem [resolvable:$true] %s616_s24 }
 0x33a   :  { %s991_s25 = scalar_lea.vmem %s617_s24, 64  ;;  %p996_p1 = scmp.lt.s32.totalorder %s617_s24, %s617_s24 }
 0x33b   :  { %p992_p0 = scmp.ne.s32.totalorder %s617_s24, %s991_s25  ;;  %p997_p2 = scmp.lt.s32.totalorder %s991_s25, %s991_s25 }
 0x33d   :  { %p998_p3 = por %p997_p2, %p996_p1 }
 0x33f   :  { %p999_p4 = pnand %p998_p3, %p992_p0 }
 0x402   :  { %v598_v17 = vpop.f32.mrb[4].mxu1 }
 0x403   :  { %v599_v18 = vadd.f32 %v676_v0, %v598_v17  ;;  %v770_v19 = vpop.f32.mrb[5].mxu1 }
 0x404   :  { %v601_v20 = vpop.f32.mrb[6].mxu1 }
 0x405   :  { %v604_v21 = vmax.f32 %v599_v18, 0.0  ;;  %v771_v22 = vpop.f32.mrb[7].mxu1 }
 0x407   :  { %v605_v23 = vpack.c.bf16 %v604_v21, %v604_v21 }
 0x409   :  { %606 = vst [vmem:[#allocation13] sm:$0xf] %v605_v23 }
 0x40a   :  { %1002 = shalt.err (!%p999_p4)
}
 0x40b   :  { %s1003_s26 = scalar_lea.hbm %s1260_s7, 64 }
 0x40c   :  { %p1004_p5 = scmp.ne.s32.totalorder %s1260_s7, %s1003_s26  ;;  %p1007_p6 = scmp.lt.u32.totalorder %s1003_s26, %s1260_s7 }
 0x40e   :  { %p1009_p7 = pnand %p1007_p6, %p1004_p5 }
 0x410   :  { %1012 = shalt.err (!%p1009_p7)
}
 0x411   :  { %619 = dma.vmem_to_hbm [thread:$0]  %s617_s24, 64, %s1260_s7, [#allocation4]  }
 0x412   :  { %1021 = dma.done.wait [#allocation4], 64  }
 0x413   :  { %1022 = vsyncadd [#allocation4], 4294967232 }
 0x414   :  { %1023 = dma.done.wait [#allocation15], 384  }
 0x415   :  { %1024 = vsyncadd [#allocation15], 4294966912 }
 0x416   :  { %636 = vsyncpa [#allocation3], 1 }
 0x417   :  { %637 = vsyncpa [#allocation6], 1 }
 0x418   :  { %638 = vsyncpa [#allocation9], 1 }
 0x419   :  { %639 = vsyncpa [#allocation12], 1 }
 0x41a   :  { %640 = vsyncpa [#allocation4], 1 }
 0x41b   :  { %641 = vsyncpa [#allocation15], 1 }

</bundles_post_ra>
